<compile_context>
chip_gen: v6e
topology: v6e:2x2x1
jax: 0.10.0
libtpu: 0.0.40
codegen_flags: <defaults>
</compile_context>

<pallas_src>
import jax
import jax.numpy as jnp
from jax.experimental import pallas as pl
from jax.experimental.pallas import tpu as pltpu

IN_DIM = 784      # 28 * 28 flattened MNIST image
HID_DIM = 10
OUT_DIM = 10
PAD = 128         # lane-dense hidden width inside the kernel


def _round_up(x, m):
    return ((x + m - 1) // m) * m


def mnist_mlp_kernel(x_ref, w1_ref, wh_ref, b_ref, o_ref):
    """Fused 4-layer MLP on one batch tile.

    x_ref : (tb, 784)     f32   raw flattened images, batch-tiled
    w1_ref: (784, 128)    bf16  fc1 weight (out-dim padded 10->128)
    wh_ref: (3, 128, 128) bf16  fc2/fc3/fc4 weights (padded 10->128)
    b_ref : (4, 128)      f32   fc1..fc4 biases (padded 10->128)
    o_ref : (tb, 10)      f32   exact f32 logits (narrow writeback)
    """
    b = b_ref[...]                                        # tiny, VMEM-resident

    # Layer 1: cast the streamed f32 rows to bf16 on the VPU (free slot),
    # bf16 MXU matmul with f32 accumulation.
    x = x_ref[...].astype(jnp.bfloat16)
    h = jnp.dot(x, w1_ref[...], preferred_element_type=jnp.float32)
    h = jnp.maximum(h + b[0:1], 0.0)                      # f32 bias+ReLU (v5e path)

    # Layers 2-3: bf16 operands, f32 accumulation, f32 elementwise.
    h = jnp.dot(h.astype(jnp.bfloat16), wh_ref[0], preferred_element_type=jnp.float32)
    h = jnp.maximum(h + b[1:2], 0.0)
    h = jnp.dot(h.astype(jnp.bfloat16), wh_ref[1], preferred_element_type=jnp.float32)
    h = jnp.maximum(h + b[2:3], 0.0)

    # Layer 4 (no ReLU); store only the 10 real logit columns.
    h = jnp.dot(h.astype(jnp.bfloat16), wh_ref[2], preferred_element_type=jnp.float32)
    h = h + b[3:4]
    o_ref[...] = h[:, :OUT_DIM].astype(o_ref.dtype)


def pack_params(params):
    """Pad f32 (in, out) params to lane-dense kernel shapes and pack them.

    fc1 weight -> (784, 128) bf16; fc2..fc4 weights -> one (3, 128, 128) bf16
    stack; biases -> one (4, 128) f32 stack.  Zero padding keeps the math on
    the first 10 lanes exactly identical.
    """
    (w1, b1), (w2, b2), (w3, b3), (w4, b4) = params
    w1p = jnp.pad(w1, ((0, 0), (0, PAD - HID_DIM))).astype(jnp.bfloat16)
    whp = jnp.stack([
        jnp.pad(w, ((0, PAD - w.shape[0]), (0, PAD - w.shape[1])))
        for w in (w2, w3, w4)
    ]).astype(jnp.bfloat16)
    bp = jnp.stack([
        jnp.pad(b.reshape(-1), (0, PAD - b.shape[-1]))
        for b in (b1, b2, b3, b4)
    ]).astype(jnp.float32)
    return (w1p, whp, bp)


def mnist_net_forward(x, packed_params, *, tb=None):
    """x: (B, 1, 28, 28) float32 (NCHW). Returns (B, 10) float32 logits."""
    B = x.shape[0]
    # Free view: contiguous NCHW -> (B, 784); no HBM pad/cast pass.
    x_flat = x.reshape(B, IN_DIM).astype(jnp.float32)

    if tb is None:
        # Big tiles amortize the ~0.35 us/step overhead; kernel is HBM-bound.
        tb = min(1024, _round_up(max(B, 8), 8))
        # Make sure v7x's two TensorCores both get at least one grid step.
        if B > 8 and pl.cdiv(B, tb) < 2:
            tb = _round_up(pl.cdiv(B, 2), 8)

    grid = (pl.cdiv(B, tb),)          # partial tail tile handled by masking
    w1p, whp, bp = packed_params

    rows = grid[0] * tb               # rows actually streamed (incl. masked tail)
    param_bytes = IN_DIM * PAD * 2 + 3 * PAD * PAD * 2 + 4 * PAD * 4
    cost = pl.CostEstimate(
        flops=2 * rows * (IN_DIM * PAD + 3 * PAD * PAD),
        transcendentals=0,
        bytes_accessed=rows * IN_DIM * 4 + B * OUT_DIM * 4 + param_bytes,
    )

    # Scoped-VMEM sizing: the double-buffered f32 x tile dominates.  Stay under
    # the 16 MiB (v5e) / 32 MiB (v6e, v7x) scoped defaults at the default tile;
    # only raise the limit (with headroom under v7x's 64 MiB physical) for
    # explicitly requested huge tiles.
    vmem_need = (2 * tb * IN_DIM * 4          # x double-buffer (f32)
                 + tb * IN_DIM * 2            # in-kernel bf16 copy of x
                 + 6 * tb * PAD * 4           # f32 intermediates
                 + 2 * tb * OUT_DIM * 4       # out double-buffer
                 + param_bytes)
    vmem_limit = None
    if vmem_need > (12 << 20):
        vmem_limit = min(vmem_need + (4 << 20), 56 << 20)

    out = pl.pallas_call(
        mnist_mlp_kernel,
        out_shape=jax.ShapeDtypeStruct((B, OUT_DIM), jnp.float32),
        grid=grid,
        in_specs=[
            pl.BlockSpec((tb, IN_DIM), lambda i: (i, 0)),      # x: batch-tiled
            pl.BlockSpec((IN_DIM, PAD), lambda i: (0, 0)),     # w1: VMEM-resident
            pl.BlockSpec((3, PAD, PAD), lambda i: (0, 0, 0)),  # w2..w4: resident
            pl.BlockSpec((4, PAD), lambda i: (0, 0)),          # b1..b4: resident
        ],
        out_specs=pl.BlockSpec((tb, OUT_DIM), lambda i: (i, 0)),
        compiler_params=pltpu.CompilerParams(
            dimension_semantics=("parallel",),
            vmem_limit_bytes=vmem_limit),
        cost_estimate=cost,
    )(x_flat, w1p, whp, bp)

    return out


def init_params(key):
    """Deterministic init mimicking nn.Linear's U(-1/sqrt(fan_in), 1/sqrt(fan_in)).

    PyTorch Linear stores weight as (out, in) and computes x @ W.T + b; we
    store weights pre-transposed as (in, out) so the kernel does x @ W + b.
    """
    dims = [(IN_DIM, HID_DIM), (HID_DIM, HID_DIM),
            (HID_DIM, HID_DIM), (HID_DIM, OUT_DIM)]
    params = []
    for i, (fan_in, fan_out) in enumerate(dims):
        kw, kb = jax.random.split(jax.random.fold_in(key, i))
        bound = 1.0 / (fan_in ** 0.5)
        w = jax.random.uniform(kw, (fan_in, fan_out), jnp.float32, -bound, bound)
        b = jax.random.uniform(kb, (1, fan_out), jnp.float32, -bound, bound)
        params.append((w, b))
    return params


def reference_forward(x, params, *, match_kernel=False):
    """Pure-JAX reference. match_kernel=True replicates the kernel's numerics
    (bf16 matmul operands, f32 accumulation, f32 bias/ReLU)."""
    h = x.reshape(x.shape[0], -1)
    (w1, b1), (w2, b2), (w3, b3), (w4, b4) = params

    if match_kernel:
        def mm(a, w):
            return jnp.dot(a.astype(jnp.bfloat16), w.astype(jnp.bfloat16),
                           preferred_element_type=jnp.float32)
    else:
        def mm(a, w):
            return jnp.dot(a, w)

    h = jnp.maximum(mm(h, w1) + b1, 0.0)
    h = jnp.maximum(mm(h, w2) + b2, 0.0)
    h = jnp.maximum(mm(h, w3) + b3, 0.0)
    return mm(h, w4) + b4


if __name__ == "__main__":
    key = jax.random.PRNGKey(0)
    k_x, k_p = jax.random.split(key)

    B = 8
    x = jax.random.normal(k_x, (B, 1, 28, 28), dtype=jnp.float32)  # NCHW MNIST
    params = init_params(k_p)
    packed = pack_params(params)

    out = mnist_net_forward(x, packed)
    out = jax.block_until_ready(out)
    assert out.shape == (B, OUT_DIM), out.shape

    # Primary check: reference with identical numerics (bf16 operands, f32 acc).
    ref_match = reference_forward(x, params, match_kernel=True)
    assert bool(jnp.allclose(out, ref_match, atol=1e-3, rtol=1e-3)), \
        "mismatch vs bf16-matched reference"

    # Sanity vs. full-f32 PyTorch-equivalent math (bf16 rounding only).
    ref_f32 = reference_forward(x, params, match_kernel=False)
    max_err = float(jnp.max(jnp.abs(out - ref_f32)))
    assert max_err < 5e-2, f"bf16 rounding error too large: {max_err}"

    print("KERNEL_OK")
</pallas_src>

<mosaic_0001>
module attributes {stable_mosaic.version = 11 : i64} {
  func.func @mnist_mlp_kernel(%arg0: i32, %arg1: memref<8x784xf32, #tpu.memory_space<vmem>>, %arg2: memref<784x128xbf16, #tpu.memory_space<vmem>>, %arg3: memref<3x128x128xbf16, #tpu.memory_space<vmem>>, %arg4: memref<4x128xf32, #tpu.memory_space<vmem>>, %arg5: memref<8x10xf32, #tpu.memory_space<vmem>>) attributes {dimension_semantics = [#tpu.dimension_semantics<parallel>], iteration_bounds = array<i64: 1>, scalar_prefetch = 0 : i64, scratch_operands = 0 : i64, tpu.core_type = #tpu.core_type<tc>, window_params = [{transform_indices = @transform_0, window_bounds = array<i64: 8, 784>}, {pipeline_mode = #tpu.pipeline_mode<synchronous>, transform_indices = @transform_1, window_bounds = array<i64: 784, 128>}, {pipeline_mode = #tpu.pipeline_mode<synchronous>, transform_indices = @transform_2, window_bounds = array<i64: 3, 128, 128>}, {pipeline_mode = #tpu.pipeline_mode<synchronous>, transform_indices = @transform_3, window_bounds = array<i64: 4, 128>}, {transform_indices = @transform_4, window_bounds = array<i64: 8, 10>}]} {
    %c0 = arith.constant 0 : index
    %c0_0 = arith.constant 0 : index
    %0 = vector.load %arg4[%c0, %c0_0] : memref<4x128xf32, #tpu.memory_space<vmem>>, vector<4x128xf32>
    %c0_1 = arith.constant 0 : index
    %c0_2 = arith.constant 0 : index
    %1 = vector.load %arg1[%c0_1, %c0_2] : memref<8x784xf32, #tpu.memory_space<vmem>>, vector<8x784xf32>
    %2 = arith.truncf %1 : vector<8x784xf32> to vector<8x784xbf16>
    %c0_3 = arith.constant 0 : index
    %c0_4 = arith.constant 0 : index
    %3 = vector.load %arg2[%c0_3, %c0_4] : memref<784x128xbf16, #tpu.memory_space<vmem>>, vector<784x128xbf16>
    %cst = arith.constant dense<0.000000e+00> : vector<8x128xf32>
    %4 = tpu.matmul %2, %3, %cst {dimension_numbers = #tpu.dot_dimension_numbers<[1], [0], [0], [1], [0, 0, 1, 1], [], []>} : vector<8x784xbf16>, vector<784x128xbf16>, vector<8x128xf32> -> vector<8x128xf32>
    %5 = vector.extract_strided_slice %0 {offsets = [0, 0], sizes = [1, 128], strides = [1, 1]} : vector<4x128xf32> to vector<1x128xf32>
    %6 = vector.broadcast %5 : vector<1x128xf32> to vector<8x128xf32>
    %7 = arith.addf %4, %6 : vector<8x128xf32>
    %cst_5 = arith.constant 0.000000e+00 : f32
    %8 = vector.broadcast %cst_5 : f32 to vector<8x128xf32>
    %9 = arith.maximumf %7, %8 : vector<8x128xf32>
    %10 = arith.truncf %9 : vector<8x128xf32> to vector<8x128xbf16>
    %c0_6 = arith.constant 0 : index
    %c0_7 = arith.constant 0 : index
    %c0_8 = arith.constant 0 : index
    %11 = vector.load %arg3[%c0_6, %c0_7, %c0_8] : memref<3x128x128xbf16, #tpu.memory_space<vmem>>, vector<1x128x128xbf16>
    %12 = vector.shape_cast %11 : vector<1x128x128xbf16> to vector<128x128xbf16>
    %cst_9 = arith.constant dense<0.000000e+00> : vector<8x128xf32>
    %13 = tpu.matmul %10, %12, %cst_9 {dimension_numbers = #tpu.dot_dimension_numbers<[1], [0], [0], [1], [0, 0, 1, 1], [], []>} : vector<8x128xbf16>, vector<128x128xbf16>, vector<8x128xf32> -> vector<8x128xf32>
    %14 = vector.extract_strided_slice %0 {offsets = [1, 0], sizes = [1, 128], strides = [1, 1]} : vector<4x128xf32> to vector<1x128xf32>
    %15 = vector.broadcast %14 : vector<1x128xf32> to vector<8x128xf32>
    %16 = arith.addf %13, %15 : vector<8x128xf32>
    %cst_10 = arith.constant 0.000000e+00 : f32
    %17 = vector.broadcast %cst_10 : f32 to vector<8x128xf32>
    %18 = arith.maximumf %16, %17 : vector<8x128xf32>
    %19 = arith.truncf %18 : vector<8x128xf32> to vector<8x128xbf16>
    %c1 = arith.constant 1 : index
    %c0_11 = arith.constant 0 : index
    %c0_12 = arith.constant 0 : index
    %20 = vector.load %arg3[%c1, %c0_11, %c0_12] : memref<3x128x128xbf16, #tpu.memory_space<vmem>>, vector<1x128x128xbf16>
    %21 = vector.shape_cast %20 : vector<1x128x128xbf16> to vector<128x128xbf16>
    %cst_13 = arith.constant dense<0.000000e+00> : vector<8x128xf32>
    %22 = tpu.matmul %19, %21, %cst_13 {dimension_numbers = #tpu.dot_dimension_numbers<[1], [0], [0], [1], [0, 0, 1, 1], [], []>} : vector<8x128xbf16>, vector<128x128xbf16>, vector<8x128xf32> -> vector<8x128xf32>
    %23 = vector.extract_strided_slice %0 {offsets = [2, 0], sizes = [1, 128], strides = [1, 1]} : vector<4x128xf32> to vector<1x128xf32>
    %24 = vector.broadcast %23 : vector<1x128xf32> to vector<8x128xf32>
    %25 = arith.addf %22, %24 : vector<8x128xf32>
    %cst_14 = arith.constant 0.000000e+00 : f32
    %26 = vector.broadcast %cst_14 : f32 to vector<8x128xf32>
    %27 = arith.maximumf %25, %26 : vector<8x128xf32>
    %28 = arith.truncf %27 : vector<8x128xf32> to vector<8x128xbf16>
    %c2 = arith.constant 2 : index
    %c0_15 = arith.constant 0 : index
    %c0_16 = arith.constant 0 : index
    %29 = vector.load %arg3[%c2, %c0_15, %c0_16] : memref<3x128x128xbf16, #tpu.memory_space<vmem>>, vector<1x128x128xbf16>
    %30 = vector.shape_cast %29 : vector<1x128x128xbf16> to vector<128x128xbf16>
    %cst_17 = arith.constant dense<0.000000e+00> : vector<8x128xf32>
    %31 = tpu.matmul %28, %30, %cst_17 {dimension_numbers = #tpu.dot_dimension_numbers<[1], [0], [0], [1], [0, 0, 1, 1], [], []>} : vector<8x128xbf16>, vector<128x128xbf16>, vector<8x128xf32> -> vector<8x128xf32>
    %32 = vector.extract_strided_slice %0 {offsets = [3, 0], sizes = [1, 128], strides = [1, 1]} : vector<4x128xf32> to vector<1x128xf32>
    %33 = vector.broadcast %32 : vector<1x128xf32> to vector<8x128xf32>
    %34 = arith.addf %31, %33 : vector<8x128xf32>
    %35 = vector.extract_strided_slice %34 {offsets = [0, 0], sizes = [8, 10], strides = [1, 1]} : vector<8x128xf32> to vector<8x10xf32>
    %c0_18 = arith.constant 0 : index
    %c0_19 = arith.constant 0 : index
    %36 = vector.load %arg5[%c0_18, %c0_19] : memref<8x10xf32, #tpu.memory_space<vmem>>, vector<8x10xf32>
    tpu.vector_store %arg5[%c0_18, %c0_19], %35 {strides = array<i32>} : memref<8x10xf32, #tpu.memory_space<vmem>>, vector<8x10xf32>,
    return
  }
  func.func @transform_0(%arg0: i32) -> (i32, i32) {
    %c0_i32 = arith.constant 0 : i32
    %c0_i32_0 = arith.constant 0 : i32
    return %arg0, %c0_i32 : i32, i32
  }
  func.func @transform_1(%arg0: i32) -> (i32, i32) {
    %c0_i32 = arith.constant 0 : i32
    %c0_i32_0 = arith.constant 0 : i32
    %c0_i32_1 = arith.constant 0 : i32
    return %c0_i32, %c0_i32_0 : i32, i32
  }
  func.func @transform_2(%arg0: i32) -> (i32, i32, i32) {
    %c0_i32 = arith.constant 0 : i32
    %c0_i32_0 = arith.constant 0 : i32
    %c0_i32_1 = arith.constant 0 : i32
    %c0_i32_2 = arith.constant 0 : i32
    return %c0_i32, %c0_i32_0, %c0_i32_1 : i32, i32, i32
  }
  func.func @transform_3(%arg0: i32) -> (i32, i32) {
    %c0_i32 = arith.constant 0 : i32
    %c0_i32_0 = arith.constant 0 : i32
    %c0_i32_1 = arith.constant 0 : i32
    return %c0_i32, %c0_i32_0 : i32, i32
  }
  func.func @transform_4(%arg0: i32) -> (i32, i32) {
    %c0_i32 = arith.constant 0 : i32
    %c0_i32_0 = arith.constant 0 : i32
    return %arg0, %c0_i32 : i32, i32
  }
}

</mosaic_0001>

<bundles_post_ra>
// kernel: tpu_custom_call.1
= control target key start
LH: loop header
LB: loop body
LE: loop exit
PB: predicated region body
PF: predicated region fallthrough
CT: control target
= control target key end

     0   :  { %9 = vsyncpa [#allocation3], 0  ;;  %s1478_s0 = inlined_call_operand.hbm [shape: f32[8,784], index: 0, kind: input, shape index: {}]   ;;  %s1479_s1 = inlined_call_operand.hbm [shape: bf16[784,128], index: 1, kind: input, shape index: {}]   ;;  %s1480_s2 = inlined_call_operand.hbm [shape: bf16[3,128,128], index: 2, kind: input, shape index: {}]   ;;  %s1481_s3 = inlined_call_operand.vmem [shape: f32[4,128], index: 3, kind: input, shape index: {}]   ;;  %s1482_s4 = inlined_call_operand.hbm [shape: f32[8,10], index: 4, kind: output, shape index: {}]  }
   0x1   :  { %10 = vsyncpa [#allocation6], 0 }
   0x2   :  { %11 = vsyncpa [#allocation4], 0  ;;  %s1385_s15 = smov [#allocation5]  }
   0x3   :  { %s27_s16 = sshll.u32 %s1385_s15, 4  ;;  %s28_s16 = int_to_ptr.vmem [resolvable:$true] %s27_s16 }
   0x4   :  { %s1307_s17 = scalar_lea.vmem %s28_s16, 6272  ;;  %p1312_p1 = scmp.lt.s32.totalorder %s28_s16, %s28_s16 }
   0x5   :  { %p1308_p0 = scmp.ne.s32.totalorder %s28_s16, %s1307_s17  ;;  %p1313_p2 = scmp.lt.s32.totalorder %s1307_s17, %s1307_s17 }
   0x7   :  { %p1314_p3 = por %p1313_p2, %p1312_p1 }
   0x9   :  { %p1315_p4 = pnand %p1314_p3, %p1308_p0 }
   0xb   :  { %1318 = shalt.err (!%p1315_p4)
}
   0xc   :  { %s1386_s18 = smov 64   ;;  %s1387_s19 = smov 4  }
   0xd   :  { %33 = dma.hbm_to_vmem [thread:$0]  %s1479_s1, 6272, %s28_s16, [#allocation6], %s1386_s18, %s1386_s18, %s1387_s19  }
   0xe   :  { %s1388_s22 = smov [#allocation2]   ;;  %s1389_s24 = smov [#allocation7]  }
   0xf   :  { %s18_s23 = sshll.u32 %s1388_s22, 4  ;;  %s39_s25 = sshll.u32 %s1389_s24, 4  ;;  %s19_s23 = int_to_ptr.vmem [resolvable:$true] %s18_s23  ;;  %s40_s25 = int_to_ptr.vmem [resolvable:$true] %s39_s25 }
  0x10   :  { %s1327_s26 = scalar_lea.vmem %s19_s23, 896  ;;  %p1332_p6 = scmp.lt.s32.totalorder %s19_s23, %s19_s23 }
  0x11   :  { %p1328_p5 = scmp.ne.s32.totalorder %s19_s23, %s1327_s26  ;;  %p1333_p7 = scmp.lt.s32.totalorder %s1327_s26, %s1327_s26 }
  0x13   :  { %p1334_p8 = por %p1333_p7, %p1332_p6 }
  0x15   :  { %p1335_p9 = pnand %p1334_p8, %p1328_p5 }
  0x17   :  { %1338 = shalt.err (!%p1335_p9)
}
  0x18   :  { %21 = dma.hbm_to_vmem [thread:$0]  %s1478_s0, 896, %s19_s23, [#allocation3]  }
  0x19   :  { %s1347_s29 = scalar_lea.vmem %s40_s25, 3072  ;;  %p1352_p11 = scmp.lt.s32.totalorder %s40_s25, %s40_s25 }
  0x1a   :  { %p1348_p10 = scmp.ne.s32.totalorder %s40_s25, %s1347_s29  ;;  %p1353_p12 = scmp.lt.s32.totalorder %s1347_s29, %s1347_s29 }
  0x1c   :  { %p1354_p13 = por %p1353_p12, %p1352_p11 }
  0x1e   :  { %p1355_p0 = pnand %p1354_p13, %p1348_p10 }
  0x20   :  { %1358 = shalt.err (!%p1355_p0)
}
  0x21   :  { %45 = dma.hbm_to_vmem [thread:$0]  %s1480_s2, 3072, %s40_s25, [#allocation6], %s1386_s18, %s1386_s18, %s1387_s19  }
  0x22   :  { %1379 = dma.done.wait [#allocation3], 896  }
  0x23   :  { %1380 = vsyncadd [#allocation3], 4294966400 }
  0x24   :  { %1381 = dma.done.wait [#allocation6], 9344  }
  0x25   :  { %1382 = vsyncadd [#allocation6], 4294957952  ;;  %v1226_v0 = vld [vmem:[#allocation5 + $0x78] sm:$0xff]   ;;  %v1230_v4 = vld [vmem:[#allocation5 + $0x70] sm:$0xff]   ;;  %v1390_v44 = vmov 0.0   ;;  %vm1391_vm0 = vmmov 0  }
  0x26   :  { %v1227_v1 = vld [vmem:[#allocation5 + $0x38] sm:$0xff]   ;;  %1057 = vmatprep.subr.bf16.mxu0 %v1226_v0  ;;  %v1231_v5 = vld [vmem:[#allocation5 + $0x30] sm:$0xff]   ;;  %v1234_v8 = vld [vmem:[#allocation5 + $0x68] sm:$0xff]   ;;  %vm469_vm1 = vcmask 130048   ;;  %vm965_vm2 = vcmask 80896  }
  0x27   :  { %v1228_v2 = vld [vmem:[#allocation5 + $0xf8] sm:$0xff]   ;;  %1058 = vmatpush3.bf16.msra.mxu0 %v1227_v1  ;;  %v1232_v6 = vld [vmem:[#allocation5 + $0xf0] sm:$0xff]   ;;  %v1235_v9 = vld [vmem:[#allocation5 + $0x28] sm:$0xff]  }
  0x28   :  { %v1229_v3 = vld [vmem:[#allocation5 + $0xb8] sm:$0xff]   ;;  %1079 = vmatprep.subr.bf16.mxu1 %v1228_v2  ;;  %1059 = vmatprep.subr.bf16.mxu0 %v1230_v4  ;;  %v1233_v7 = vld [vmem:[#allocation5 + $0xb0] sm:$0xff]   ;;  %v1236_v10 = vld [vmem:[#allocation5 + $0xe8] sm:$0xff]  }
  0x29   :  { %1080 = vmatpush3.bf16.msra.mxu1 %v1229_v3  ;;  %v1237_v11 = vld [vmem:[#allocation5 + $0xa8] sm:$0xff]   ;;  %v1238_v12 = vld [vmem:[#allocation5 + $0x60] sm:$0xff]   ;;  %v1242_v16 = vld [vmem:[#allocation5 + $0x58] sm:$0xff]  }
  0x2a   :  { %1081 = vmatprep.subr.bf16.mxu1 %v1232_v6  ;;  %v1239_v13 = vld [vmem:[#allocation5 + $0x20] sm:$0xff]   ;;  %v1243_v17 = vld [vmem:[#allocation5 + $0x18] sm:$0xff]   ;;  %v1246_v20 = vld [vmem:[#allocation5 + $0x50] sm:$0xff]  }
  0x2b   :  { %1060 = vmatpush3.bf16.msra.mxu0 %v1231_v5  ;;  %v1240_v14 = vld [vmem:[#allocation5 + $0xe0] sm:$0xff]   ;;  %v1244_v18 = vld [vmem:[#allocation5 + $0xd8] sm:$0xff]   ;;  %v1247_v21 = vld [vmem:[#allocation5 + $0x10] sm:$0xff]  }
  0x2c   :  { %1061 = vmatprep.subr.bf16.mxu0 %v1234_v8  ;;  %v1241_v15 = vld [vmem:[#allocation5 + $0xa0] sm:$0xff]   ;;  %v1245_v19 = vld [vmem:[#allocation5 + $0x98] sm:$0xff]   ;;  %v1248_v22 = vld [vmem:[#allocation5 + $0xd0] sm:$0xff]  }
  0x2d   :  { %1082 = vmatpush3.bf16.msra.mxu1 %v1233_v7  ;;  %v1249_v23 = vld [vmem:[#allocation5 + $0x90] sm:$0xff]   ;;  %v1250_v24 = vld [vmem:[#allocation5 + $0x48] sm:$0xff]   ;;  %v1254_v28 = vld [vmem:[#allocation5 + $0x40] sm:$0xff]  }
  0x2e   :  { %1083 = vmatprep.subr.bf16.mxu1 %v1236_v10  ;;  %v1251_v25 = vld [vmem:[#allocation5 + $0x8] sm:$0xff]   ;;  %v1255_v29 = vld [vmem:[#allocation5] sm:$0xff]   ;;  %v60_v31 = vld [vmem:[#allocation2 + $0x8] sm:$0xff] }
  0x2f   :  { %1062 = vmatpush3.bf16.msra.mxu0 %v1235_v9  ;;  %v1252_v26 = vld [vmem:[#allocation5 + $0xc8] sm:$0xff]   ;;  %v1256_v30 = vld [vmem:[#allocation5 + $0xc0] sm:$0xff]   ;;  %v67_v32 = vpack.c.bf16 %v60_v31, %v60_v31  ;;  %v1258_v36 = vld [vmem:[#allocation5 + $0x178] sm:$0xff]  }
  0x30   :  { %1063 = vmatprep.subr.bf16.mxu0 %v1238_v12  ;;  %v1253_v27 = vld [vmem:[#allocation5 + $0x88] sm:$0xff]   ;;  %v1257_v33 = vld [vmem:[#allocation5 + $0x80] sm:$0xff]   ;;  %v1259_v39 = vld [vmem:[#allocation5 + $0x138] sm:$0xff]  }
  0x31   :  { %1084 = vmatpush3.bf16.msra.mxu1 %v1237_v11  ;;  %v59_v34 = vld [vmem:[#allocation2] sm:$0xff]  ;;  %v62_v37 = vld [vmem:[#allocation2 + $0x18] sm:$0xff]  ;;  %505 = vmatprep.mubr.bf16.mxu0 %v67_v32  ;;  %v61_v40 = vld [vmem:[#allocation2 + $0x10] sm:$0xff] }
  0x32   :  { %1085 = vmatprep.subr.bf16.mxu1 %v1240_v14  ;;  %v66_v35 = vpack.c.bf16 %v59_v34, %v59_v34  ;;  %v69_v38 = vpack.c.bf16 %v62_v37, %v62_v37  ;;  %v68_v41 = vpack.c.bf16 %v61_v40, %v61_v40  ;;  %v1260_v42 = vld [vmem:[#allocation5 + $0x170] sm:$0xff]   ;;  %v1262_v45 = vld [vmem:[#allocation5 + $0x168] sm:$0xff]   ;;  %v1264_v47 = vld [vmem:[#allocation5 + $0x160] sm:$0xff]  }
  0x33   :  { %1064 = vmatpush3.bf16.msra.mxu0 %v1239_v13  ;;  %v1261_v43 = vld [vmem:[#allocation5 + $0x130] sm:$0xff]   ;;  %v1263_v46 = vld [vmem:[#allocation5 + $0x128] sm:$0xff]   ;;  %v1265_v48 = vld [vmem:[#allocation5 + $0x120] sm:$0xff]  }
  0x34   :  { %1065 = vmatprep.subr.bf16.mxu0 %v1242_v16  ;;  %545 = vmatprep.mubr.bf16.mxu1 %v69_v38  ;;  %v1266_v49 = vld [vmem:[#allocation5 + $0x158] sm:$0xff]   ;;  %v1268_v51 = vld [vmem:[#allocation5 + $0x150] sm:$0xff]   ;;  %v1274_v53 = vld [vmem:[#allocation5 + $0x180] sm:$0xff]  }
  0x35   :  { %1086 = vmatpush3.bf16.msra.mxu1 %v1241_v15  ;;  %v1267_v50 = vld [vmem:[#allocation5 + $0x118] sm:$0xff]   ;;  %v1269_v52 = vld [vmem:[#allocation5 + $0x110] sm:$0xff]   ;;  %v1270_v55 = vld [vmem:[#allocation5 + $0x148] sm:$0xff]  }
  0x36   :  { %1087 = vmatprep.subr.bf16.mxu1 %v1244_v18  ;;  %v64_v54 = vld [vmem:[#allocation2 + $0x28] sm:$0xff]  ;;  %v65_v57 = vld [vmem:[#allocation2 + $0x30] sm:$0xff]  ;;  %v1271_v59 = vld [vmem:[#allocation5 + $0x108] sm:$0xff]  }
  0x37   :  { %1066 = vmatpush3.bf16.msra.mxu0 %v1243_v17  ;;  %v71_v56 = vpack.c.bf16 %v64_v54, %v64_v54  ;;  %v72_v58 = vpack.c.bf16 %v65_v57, %v65_v57  ;;  %v1272_v60 = vld [vmem:[#allocation5 + $0x140] sm:$0xff]   ;;  %v63_v62 = vld [vmem:[#allocation2 + $0x20] sm:$0xff]  ;;  %v1276_v1 = vld [vmem:[#allocation7 + $0x30] sm:$0xff]  }
  0x38   :  { %1067 = vmatprep.subr.bf16.mxu0 %v1246_v20  ;;  %v1273_v61 = vld [vmem:[#allocation5 + $0x100] sm:$0xff]   ;;  %v70_v63 = vpack.c.bf16 %v63_v62, %v63_v62  ;;  %v1277_v2 = vld [vmem:[#allocation7 + $0x28] sm:$0xff]   ;;  %v1278_v3 = vld [vmem:[#allocation7 + $0x20] sm:$0xff]  }
  0x39   :  { %1088 = vmatpush3.bf16.msra.mxu1 %v1245_v19  ;;  %v1275_v0 = vld [vmem:[#allocation7 + $0x38] sm:$0xff]   ;;  %v1280_v5 = vld [vmem:[#allocation7 + $0x10] sm:$0xff]   ;;  %v1281_v6 = vld [vmem:[#allocation7 + $0x8] sm:$0xff]  }
  0x3a   :  { %1089 = vmatprep.subr.bf16.mxu1 %v1248_v22  ;;  %v1279_v4 = vld [vmem:[#allocation7 + $0x18] sm:$0xff]   ;;  %v1282_v7 = vld [vmem:[#allocation7] sm:$0xff]   ;;  %v1284_v9 = vld [vmem:[#allocation7 + $0x70] sm:$0xff]   ;;  %v171_v22 = vlaneseq }
  0x3b   :  { %1068 = vmatpush3.bf16.msra.mxu0 %v1247_v21  ;;  %v1283_v8 = vld [vmem:[#allocation7 + $0x78] sm:$0xff]   ;;  %v1285_v10 = vld [vmem:[#allocation7 + $0x68] sm:$0xff]   ;;  %v1286_v11 = vld [vmem:[#allocation7 + $0x60] sm:$0xff]  }
  0x3c   :  { %1069 = vmatprep.subr.bf16.mxu0 %v1250_v24  ;;  %v1287_v12 = vld [vmem:[#allocation7 + $0x58] sm:$0xff]   ;;  %v1288_v13 = vld [vmem:[#allocation7 + $0x50] sm:$0xff]   ;;  %v1297_v62 = vld [vmem:[#allocation7 + $0x88] sm:$0xff]  }
  0x3d   :  { %1090 = vmatpush3.bf16.msra.mxu1 %v1249_v23  ;;  %v1450_v23 = vshrl.u32 %v171_v22, 7 }
  0x3e   :  { %1091 = vmatprep.subr.bf16.mxu1 %v1252_v26 }
  0x3f   :  { %1070 = vmatpush3.bf16.msra.mxu0 %v1251_v25  ;;  %v173_v26 = vsub.s32 0, %v1450_v23 }
  0x40   :  { %1071 = vmatprep.subr.bf16.mxu0 %v1254_v28 }
  0x41   :  { %1092 = vmatpush3.bf16.msra.mxu1 %v1253_v27  ;;  %v1456_v27 = vld [vmem:[%s1481_s3] sm:$0xf]  ;;  %s1392_s3 = smov [#allocation8]  }
  0x42   :  { %1093 = vmatprep.subr.bf16.mxu1 %v1256_v30  ;;  %v174_v30 = vrot.slane %v1456_v27, %v173_v26  ;;  %s973_s5 = sshll.u32 %s1392_s3, 4  ;;  %s974_s5 = int_to_ptr.vmem [resolvable:$true] %s973_s5 }
  0x43   :  { %1072 = vmatpush3.bf16.msra.mxu0 %v1255_v29  ;;  %s1359_s6 = scalar_lea.vmem %s974_s5, 128  ;;  %p1364_p2 = scmp.lt.s32.totalorder %s974_s5, %s974_s5 }
  0x44   :  { %1101 = vmatprep.subr.bf16.mxu0 %v1258_v36  ;;  %p1360_p1 = scmp.ne.s32.totalorder %s974_s5, %s1359_s6  ;;  %p1365_p3 = scmp.lt.s32.totalorder %s1359_s6, %s1359_s6 }
  0x45   :  { %1094 = vmatpush3.bf16.msra.mxu1 %v1257_v33 }
  0x46   :  { %506 = vmatmul.mubr.bf16.vlgmr.msra.gmra.mxu0 %v66_v35  ;;  %1152 = vmatprep.subr.bf16.mxu1 %v1390_v44  ;;  %p1366_p4 = por %p1365_p3, %p1364_p2 }
  0x47   :  { %1102 = vmatpush3.bf16.msra.mxu0 %v1259_v39  ;;  %585 = vmatprep.mubr.bf16.mxu0 %v71_v56 }
  0x48   :  { %546 = vmatmul.mubr.bf16.vlgmr.msra.gmra.mxu1 %v68_v41  ;;  %1103 = vmatprep.subr.bf16.mxu0 %v1260_v42  ;;  %p1367_p5 = pnand %p1366_p4, %p1360_p1 }
  0x49   :  { %1154 = vmatprep.mubr.msk.bf16.mxu1 %vm1391_vm0, %v1390_v44  ;;  %1153 = vmatpush3.bf16.msra.mxu1 %v1274_v53  ;;  %v653_v53 = vsub.s32 1, %v1450_v23 }
  0x4a   :  { %1158 = vmatprep.subr.bf16.mxu1 %v1390_v44 }
  0x4b   :  { %1104 = vmatpush3.bf16.msra.mxu0 %v1261_v43  ;;  %v654_v54 = vrot.slane %v1456_v27, %v653_v53 }
  0x4c   :  { %1105 = vmatprep.subr.bf16.mxu0 %v1262_v45  ;;  %v1289_v45 = vld [vmem:[#allocation7 + $0x48] sm:$0xff]  }
  0x4f   :  { %1106 = vmatpush3.bf16.msra.mxu0 %v1263_v46  ;;  %v1290_v46 = vld [vmem:[#allocation7 + $0x40] sm:$0xff]  }
  0x50   :  { %1107 = vmatprep.subr.bf16.mxu0 %v1264_v47  ;;  %1155 = vmatmul.mubr.msk.bf16.vlgmr.msra.gmra.mxu1 %vm469_vm1, %v72_v58  ;;  %v1291_v47 = vld [vmem:[#allocation7 + $0xb8] sm:$0xff]  }
  0x51   :  { %1174 = vmatprep.mubr.msk.bf16.mxu1 %vm1391_vm0, %v1390_v44  ;;  %1159 = vmatpush3.bf16.msra.mxu1 %v1275_v0  ;;  %v764_v0 = vsub.s32 2, %v1450_v23 }
  0x52   :  { %1160 = vmatprep.subr.bf16.mxu1 %v1390_v44 }
  0x53   :  { %1108 = vmatpush3.bf16.msra.mxu0 %v1265_v48  ;;  %v1292_v48 = vld [vmem:[#allocation7 + $0xb0] sm:$0xff]  }
  0x54   :  { %1109 = vmatprep.subr.bf16.mxu0 %v1266_v49  ;;  %v1293_v49 = vld [vmem:[#allocation7 + $0xa8] sm:$0xff]  }
  0x55   :  { %1161 = vmatpush3.bf16.msra.mxu1 %v1276_v1  ;;  %v765_v1 = vrot.slane %v1456_v27, %v764_v0 }
  0x56   :  { %1162 = vmatprep.subr.bf16.mxu1 %v1390_v44 }
  0x57   :  { %1110 = vmatpush3.bf16.msra.mxu0 %v1267_v50  ;;  %v1294_v50 = vld [vmem:[#allocation7 + $0xa0] sm:$0xff]  }
  0x58   :  { %1111 = vmatprep.subr.bf16.mxu0 %v1268_v51  ;;  %v1295_v51 = vld [vmem:[#allocation7 + $0x98] sm:$0xff]  }
  0x59   :  { %1163 = vmatpush3.bf16.msra.mxu1 %v1277_v2 }
  0x5a   :  { %1164 = vmatprep.subr.bf16.mxu1 %v1390_v44 }
  0x5b   :  { %1112 = vmatpush3.bf16.msra.mxu0 %v1269_v52  ;;  %v1296_v52 = vld [vmem:[#allocation7 + $0x90] sm:$0xff]  }
  0x5c   :  { %1113 = vmatprep.subr.bf16.mxu0 %v1270_v55 }
  0x5d   :  { %1165 = vmatpush3.bf16.msra.mxu1 %v1278_v3 }
  0x5e   :  { %1166 = vmatprep.subr.bf16.mxu1 %v1390_v44 }
  0x5f   :  { %1114 = vmatpush3.bf16.msra.mxu0 %v1271_v59 }
  0x60   :  { %1115 = vmatprep.subr.bf16.mxu0 %v1272_v60 }
  0x61   :  { %1167 = vmatpush3.bf16.msra.mxu1 %v1279_v4 }
  0x62   :  { %1168 = vmatprep.subr.bf16.mxu1 %v1390_v44 }
  0x63   :  { %1116 = vmatpush3.bf16.msra.mxu0 %v1273_v61 }
  0x64   :  { %1178 = vmatprep.subr.bf16.mxu0 %v1390_v44 }
  0x65   :  { %1169 = vmatpush3.bf16.msra.mxu1 %v1280_v5 }
  0x66   :  { %586 = vmatmul.mubr.bf16.vlgmr.msra.gmra.mxu0 %v70_v63  ;;  %1170 = vmatprep.subr.bf16.mxu1 %v1390_v44  ;;  %v1298_v63 = vld [vmem:[#allocation7 + $0x80] sm:$0xff]  }
  0x67   :  { %1194 = vmatprep.mubr.msk.bf16.mxu0 %vm1391_vm0, %v1390_v44  ;;  %1179 = vmatpush3.bf16.msra.mxu0 %v1283_v8 }
  0x68   :  { %1180 = vmatprep.subr.bf16.mxu0 %v1390_v44 }
  0x69   :  { %1171 = vmatpush3.bf16.msra.mxu1 %v1281_v6 }
  0x6a   :  { %1172 = vmatprep.subr.bf16.mxu1 %v1390_v44 }
  0x6b   :  { %1181 = vmatpush3.bf16.msra.mxu0 %v1284_v9  ;;  %v875_v9 = vsub.s32 3, %v1450_v23 }
  0x6c   :  { %1182 = vmatprep.subr.bf16.mxu0 %v1390_v44 }
  0x6d   :  { %1173 = vmatpush3.bf16.msra.mxu1 %v1282_v7 }
  0x6e   :  { %1198 = vmatprep.subr.bf16.mxu1 %v1390_v44 }
  0x6f   :  { %1183 = vmatpush3.bf16.msra.mxu0 %v1285_v10  ;;  %v876_v10 = vrot.slane %v1456_v27, %v875_v9 }
  0x70   :  { %1184 = vmatprep.subr.bf16.mxu0 %v1390_v44 }
  0x73   :  { %1185 = vmatpush3.bf16.msra.mxu0 %v1286_v11 }
  0x74   :  { %1186 = vmatprep.subr.bf16.mxu0 %v1390_v44 }
  0x77   :  { %1187 = vmatpush3.bf16.msra.mxu0 %v1287_v12 }
  0x78   :  { %1188 = vmatprep.subr.bf16.mxu0 %v1390_v44 }
  0x7b   :  { %1189 = vmatpush3.bf16.msra.mxu0 %v1288_v13 }
  0x7c   :  { %1190 = vmatprep.subr.bf16.mxu0 %v1390_v44 }
  0x7f   :  { %1191 = vmatpush3.bf16.msra.mxu0 %v1289_v45 }
  0x80   :  { %1192 = vmatprep.subr.bf16.mxu0 %v1390_v44 }
  0x83   :  { %1193 = vmatpush3.bf16.msra.mxu0 %v1290_v46 }
 0x106   :  { %v1073_v14 = vpop.f32.mrf.mxu0 }
 0x108   :  { %v1074_v15 = vpop.f32.mrf.mxu0  ;;  %v1095_v16 = vpop.f32.mrf.mxu1 }
 0x109   :  { %v1075_v31 = vadd.f32 %v1074_v15, %v1073_v14 }
 0x10a   :  { %v1076_v17 = vpop.f32.mrf.mxu0  ;;  %v1096_v18 = vpop.f32.mrf.mxu1 }
 0x10b   :  { %v508_v32 = vadd.f32 %v1075_v31, %v174_v30  ;;  %v1097_v33 = vadd.f32 %v1096_v18, %v1095_v16 }
 0x10c   :  { %v1077_v19 = vpop.f32.mrf.mxu0  ;;  %v1098_v20 = vpop.f32.mrf.mxu1 }
 0x10d   :  { %v548_v36 = vadd.f32 %v1097_v33, %v508_v32 }
 0x10e   :  { %v1099_v21 = vpop.f32.mrf.mxu1 }
 0x110   :  { %v627_v24 = vpop.f32.mrf.mxu1 }
 0x112   :  { %v1156_v25 = vpop.f32.mrf.mxu1 }
 0x114   :  { %v630_v28 = vpop.f32.mrf.mxu1 }
 0x116   :  { %v1157_v29 = vpop.f32.mrf.mxu1 }
 0x126   :  { %v1117_v34 = vpop.f32.mrf.mxu0 }
 0x128   :  { %v1118_v35 = vpop.f32.mrf.mxu0 }
 0x129   :  { %v1119_v37 = vadd.f32 %v1118_v35, %v1117_v34 }
 0x12a   :  { %v1120_v38 = vpop.f32.mrf.mxu0 }
 0x12b   :  { %v588_v39 = vadd.f32 %v1119_v37, %v548_v36 }
 0x12c   :  { %v1121_v40 = vpop.f32.mrf.mxu0 }
 0x12d   :  { %v628_v41 = vadd.f32 %v627_v24, %v588_v39 }
 0x12f   :  { %v633_v42 = vmax.f32 %v628_v41, 0.0 }
 0x131   :  { %v634_v43 = vpack.c.bf16 %v633_v42, %v633_v42 }
 0x133   :  { %1175 = vmatmul.mubr.bf16.vlgmr.msra.gmra.mxu1 %v634_v43 }
 0x134   :  { %1214 = vmatprep.mubr.msk.bf16.mxu1 %vm1391_vm0, %v1390_v44  ;;  %1199 = vmatpush3.bf16.msra.mxu1 %v1291_v47 }
 0x135   :  { %1200 = vmatprep.subr.bf16.mxu1 %v1390_v44 }
 0x138   :  { %1201 = vmatpush3.bf16.msra.mxu1 %v1292_v48 }
 0x139   :  { %1202 = vmatprep.subr.bf16.mxu1 %v1390_v44 }
 0x13c   :  { %1203 = vmatpush3.bf16.msra.mxu1 %v1293_v49 }
 0x13d   :  { %1204 = vmatprep.subr.bf16.mxu1 %v1390_v44 }
 0x140   :  { %1205 = vmatpush3.bf16.msra.mxu1 %v1294_v50 }
 0x141   :  { %1206 = vmatprep.subr.bf16.mxu1 %v1390_v44 }
 0x144   :  { %1207 = vmatpush3.bf16.msra.mxu1 %v1295_v51 }
 0x145   :  { %1208 = vmatprep.subr.bf16.mxu1 %v1390_v44 }
 0x148   :  { %1209 = vmatpush3.bf16.msra.mxu1 %v1296_v52 }
 0x149   :  { %1210 = vmatprep.subr.bf16.mxu1 %v1390_v44 }
 0x14c   :  { %1211 = vmatpush3.bf16.msra.mxu1 %v1297_v62 }
 0x14d   :  { %1212 = vmatprep.subr.bf16.mxu1 %v1390_v44 }
 0x150   :  { %1213 = vmatpush3.bf16.msra.mxu1 %v1298_v63 }
 0x1f3   :  { %v737_v55 = vpop.f32.mrf.mxu1 }
 0x1f4   :  { %v738_v56 = vadd.f32 %v737_v55, %v654_v54 }
 0x1f5   :  { %v1176_v57 = vpop.f32.mrf.mxu1 }
 0x1f6   :  { %v743_v58 = vmax.f32 %v738_v56, 0.0 }
 0x1f7   :  { %v740_v59 = vpop.f32.mrf.mxu1 }
 0x1f8   :  { %v744_v60 = vpack.c.bf16 %v743_v58, %v743_v58 }
 0x1f9   :  { %v1177_v61 = vpop.f32.mrf.mxu1 }
 0x1fa   :  { %1195 = vmatmul.mubr.bf16.vlgmr.msra.gmra.mxu0 %v744_v60 }
 0x2ba   :  { %v848_v2 = vpop.f32.mrf.mxu0 }
 0x2bb   :  { %v849_v3 = vadd.f32 %v848_v2, %v765_v1 }
 0x2bc   :  { %v1196_v4 = vpop.f32.mrf.mxu0 }
 0x2bd   :  { %v854_v5 = vmax.f32 %v849_v3, 0.0 }
 0x2be   :  { %v851_v6 = vpop.f32.mrf.mxu0 }
 0x2bf   :  { %v855_v7 = vpack.c.bf16 %v854_v5, %v854_v5 }
 0x2c0   :  { %v1197_v8 = vpop.f32.mrf.mxu0 }
 0x2c1   :  { %1215 = vmatmul.mubr.bf16.vlgmr.msra.gmra.mxu1 %v855_v7 }
 0x381   :  { %v959_v44 = vpop.f32.mrf.mxu1 }
 0x382   :  { %v960_v11 = vadd.f32 %v959_v44, %v876_v10 }
 0x383   :  { %v1216_v12 = vpop.f32.mrf.mxu1 }
 0x384   :  { %966 = vst.msk [vmem:[#allocation8] sm:$0xff] %vm965_vm2, %v960_v11 }
 0x385   :  { %v962_v13 = vpop.f32.mrf.mxu1 }
 0x386   :  { %1370 = shalt.err (!%p1367_p5)
}
 0x387   :  { %976 = dma.vmem_to_hbm [thread:$0]  %s974_s5, 128, %s1482_s4, [#allocation4]   ;;  %v1217_v14 = vpop.f32.mrf.mxu1 }
 0x388   :  { %1383 = dma.done.wait [#allocation4], 128  }
 0x389   :  { %1384 = vsyncadd [#allocation4], 4294967168 }
 0x38a   :  { %980 = vsyncpa [#allocation3], 1 }
 0x38b   :  { %981 = vsyncpa [#allocation6], 1 }
 0x38c   :  { %982 = vsyncpa [#allocation4], 1 }

</bundles_post_ra>
